<compile_context>
chip_gen: v5e
topology: v5e:2x2
jax: 0.10.0
libtpu: 0.0.40
codegen_flags: <defaults>
</compile_context>

<pallas_src>
import math
import re
from functools import partial

import jax
import jax.numpy as jnp
from jax.experimental import pallas as pl
from jax.experimental.pallas import tpu as pltpu


_SQRT_HALF = 0.7071067811865476


def _round_up(x, m):
    return (x + m - 1) // m * m


def _gelu_erf(x):
    """Exact (erf-based) GELU matching nn.GELU() default.

    erf via Abramowitz & Stegun 7.1.26 (|err| <= 1.5e-7 at f32); the f32 divide
    is replaced by an approximate EUP reciprocal (separate issue slot) and the
    sign handling is folded into one select:
        1 + erf(x/sqrt(2)) = 2 - e   for x >= 0
                           = e       for x <  0,   e = poly(t) * exp(-x^2/2).
    Runs in x.dtype (bf16 on v6e/v7x, f32 on v5e).
    """
    p = 0.3275911
    a1, a2, a3, a4, a5 = (0.254829592, -0.284496736, 1.421413741,
                          -1.453152027, 1.061405429)
    za = jnp.abs(x) * _SQRT_HALF                       # |x| / sqrt(2)
    denom = 1.0 + p * za
    t = pl.reciprocal(denom.astype(jnp.float32), approx=True).astype(x.dtype)
    poly = ((((a5 * t + a4) * t + a3) * t + a2) * t + a1) * t
    e = poly * jnp.exp(-(za * za))                     # = 1 - erf(|x|/sqrt(2))
    return 0.5 * x * jnp.where(x >= 0, 2.0 - e, e)


def _mlp_kernel(x_ref, w1_ref, b1_ref, w2_ref, b2_ref, o_ref, *,
                h_chunk, gelu_dtype):
    """Fused fc1 + bias + GELU + fc2 + bias for one row tile."""
    cdt = w1_ref.dtype                        # MXU operand dtype (bf16)
    xb = x_ref[...].astype(cdt)               # in-kernel cast of the row tile
    h_p = w1_ref.shape[1]
    acc = None
    # Unrolled hidden-dim chunking: independent chunks overlap GELU (VALU/EUP)
    # with the neighbouring chunks' matmuls (MXU) and bound the live f32
    # intermediate to (tm, h_chunk).  Padded hidden columns are all-zero in
    # both W1 and W2, so they contribute exactly zero to acc.
    for c0 in range(0, h_p, h_chunk):
        c1 = min(c0 + h_chunk, h_p)
        h_c = jnp.dot(xb, w1_ref[:, c0:c1],
                      preferred_element_type=jnp.float32)        # MXU, f32 acc
        a_c = (h_c + b1_ref[:, c0:c1]).astype(gelu_dtype)         # bias in f32
        g_c = _gelu_erf(a_c).astype(cdt)
        p_c = jnp.dot(g_c, w2_ref[c0:c1, :],
                      preferred_element_type=jnp.float32)         # MXU, f32 acc
        acc = p_c if acc is None else acc + p_c
    o_ref[...] = (acc + b2_ref[...]).astype(o_ref.dtype)


def _tpu_config():
    """Per-generation tuning: row tile, VMEM budget, core count, GELU dtype."""
    gen = 0
    try:
        kind = jax.devices()[0].device_kind
        mt = re.search(r"(\d+)", kind)
        if mt is not None and "tpu" in kind.lower():
            gen = int(mt.group(1))
    except Exception:
        pass
    if gen >= 7:   # v7x: 64 MiB VMEM per TC, 2 TensorCores, bf16 VPU/EUP
        return dict(tm=256, vmem_limit=48 * 1024 * 1024, cores=2,
                    gelu_dtype=jnp.bfloat16)
    if gen == 6:   # v6e: 128 MiB VMEM, bf16 VPU/EUP
        return dict(tm=512, vmem_limit=96 * 1024 * 1024, cores=1,
                    gelu_dtype=jnp.bfloat16)
    if gen == 5:   # v5e/v5p: 128 MiB VMEM, f32-only VPU/EUP
        return dict(tm=512, vmem_limit=96 * 1024 * 1024, cores=1,
                    gelu_dtype=jnp.float32)
    # Unknown / older chips / interpret mode: conservative defaults.
    return dict(tm=256, vmem_limit=64 * 1024 * 1024, cores=1,
                gelu_dtype=jnp.float32)


def _choose_row_tiling(m, tm, granule, num_cores):
    """Pick (row_tile, padded_rows); ensure >=2 grid steps on 2-core chips."""
    tm = max(granule, _round_up(tm, granule))
    if m > tm:
        return tm, _round_up(m, tm)
    fit = _round_up(max(m, granule), granule)        # whole thing in one tile
    if num_cores >= 2 and fit >= 2 * granule:
        # v7x has 2 TensorCores: split into two "parallel" grid steps so both
        # cores get work instead of one sitting idle.
        half = _round_up((fit + 1) // 2, granule)
        return half, 2 * half
    return fit, fit


def pack_mlp_params(fc1_w, fc1_b, fc2_w, fc2_b, compute_dtype=jnp.bfloat16):
    """One-time weight prep (hoisted out of the forward path).

    PyTorch nn.Linear layout in:  fc1_w (hidden, in), fc2_w (out, hidden).
    Returns transposed, 128-padded, compute_dtype weights + f32 biases.
    """
    hidden, din = fc1_w.shape
    dout, hidden2 = fc2_w.shape
    assert hidden == hidden2 and fc1_b.shape == (hidden,) and fc2_b.shape == (dout,)
    din_p, h_p, dout_p = (_round_up(d, 128) for d in (din, hidden, dout))
    w1 = jnp.pad(fc1_w.T.astype(compute_dtype),
                 ((0, din_p - din), (0, h_p - hidden)))
    b1 = jnp.pad(fc1_b.astype(jnp.float32), (0, h_p - hidden)).reshape(1, h_p)
    w2 = jnp.pad(fc2_w.T.astype(compute_dtype),
                 ((0, h_p - hidden), (0, dout_p - dout)))
    b2 = jnp.pad(fc2_b.astype(jnp.float32), (0, dout_p - dout)).reshape(1, dout_p)
    return (w1, b1, w2, b2, (din, hidden, dout))


def mlp_forward(x, packed_params, *, tm=None, h_chunk=512):
    """Mlp forward: fc2(gelu(fc1(x))); Dropout(p=0) is identity.

    Precision contract: bf16 matmul operands (incl. the hidden activation
    between fc1 and fc2) with f32 accumulation; bias adds in f32; GELU math in
    bf16 on v6e/v7x and f32 on v5e.
    """
    w1, b1, w2, b2, (din, hidden, dout) = packed_params
    *lead, din_x = x.shape
    assert din_x == din
    m = math.prod(lead) if lead else 1

    cfg = _tpu_config()
    tm = tm if tm is not None else cfg["tm"]
    gelu_dtype = (cfg["gelu_dtype"]
                  if jnp.dtype(w1.dtype).itemsize == 2 else jnp.float32)

    din_p, h_p = w1.shape
    dout_p = w2.shape[1]
    h_chunk = min(h_p, max(128, (h_chunk // 128) * 128))

    # Row tiles rounded to bf16 sublane packing (16) when compute dtype is
    # 2 bytes; x itself stays in its original dtype (cast happens in-kernel).
    granule = 16 if jnp.dtype(w1.dtype).itemsize == 2 else 8
    tm_eff, m_pad = _choose_row_tiling(m, tm, granule, cfg["cores"])

    x2 = jnp.pad(x.reshape(m, din), ((0, m_pad - m), (0, din_p - din)))

    def _nbytes(a):
        return int(a.size) * jnp.dtype(a.dtype).itemsize

    cost = pl.CostEstimate(
        flops=2 * m * (din * hidden + hidden * dout),
        transcendentals=2 * m * hidden,   # exp + approx reciprocal per element
        bytes_accessed=int(_nbytes(x2) + _nbytes(w1) + _nbytes(b1)
                           + _nbytes(w2) + _nbytes(b2)
                           + m_pad * dout_p * jnp.dtype(x.dtype).itemsize),
    )

    kernel = partial(_mlp_kernel, h_chunk=h_chunk, gelu_dtype=gelu_dtype)

    def run(single_buffer_weights):
        # Resident operands (constant index_map): request a single VMEM buffer
        # so the weights aren't needlessly double-buffered.
        resident_kw = (dict(pipeline_mode=pl.Buffered(1))
                       if single_buffer_weights else {})
        in_specs = [
            pl.BlockSpec((tm_eff, din_p), lambda i: (i, 0)),               # x tile (pipelined)
            pl.BlockSpec((din_p, h_p), lambda i: (0, 0), **resident_kw),   # W1 (resident)
            pl.BlockSpec((1, h_p), lambda i: (0, 0), **resident_kw),       # b1 (resident)
            pl.BlockSpec((h_p, dout_p), lambda i: (0, 0), **resident_kw),  # W2 (resident)
            pl.BlockSpec((1, dout_p), lambda i: (0, 0), **resident_kw),    # b2 (resident)
        ]
        return pl.pallas_call(
            kernel,
            out_shape=jax.ShapeDtypeStruct((m_pad, dout_p), x.dtype),
            grid=(m_pad // tm_eff,),
            in_specs=in_specs,
            out_specs=pl.BlockSpec((tm_eff, dout_p), lambda i: (i, 0)),
            compiler_params=pltpu.CompilerParams(
                dimension_semantics=("parallel",),     # shard row tiles across TCs
                vmem_limit_bytes=cfg["vmem_limit"]),
            cost_estimate=cost,
        )(x2, w1, b1, w2, b2)

    try:
        out = run(single_buffer_weights=True)
    except Exception:
        # Fallback for jax builds without BlockSpec(pipeline_mode=...);
        # identical kernel, default (double-buffered) resident weights.
        out = run(single_buffer_weights=False)

    return out[:m, :dout].reshape(*lead, dout)


if __name__ == "__main__":
    # Small shapes consistent with the module: batch=2, seq=8, in_features=32,
    # hidden_features=64, out_features=32 (Mlp applied to ViT-style tokens).
    B, S, DIN, HID, DOUT = 2, 8, 32, 64, 32

    key = jax.random.PRNGKey(0)
    kx, kw1, kb1, kw2, kb2 = jax.random.split(key, 5)
    x = jax.random.normal(kx, (B, S, DIN), dtype=jnp.float32)
    fc1_w = jax.random.normal(kw1, (HID, DIN), dtype=jnp.float32) * 0.02
    fc1_b = jax.random.normal(kb1, (HID,), dtype=jnp.float32) * 0.02
    fc2_w = jax.random.normal(kw2, (DOUT, HID), dtype=jnp.float32) * 0.02
    fc2_b = jax.random.normal(kb2, (DOUT,), dtype=jnp.float32) * 0.02

    params = pack_mlp_params(fc1_w, fc1_b, fc2_w, fc2_b)   # one-time weight prep
    out = mlp_forward(x, params)
    out = jax.block_until_ready(out)
    assert out.shape == (B, S, DOUT)

    # Reference: same mixed precision (bf16 matmul operands, f32 accumulation)
    # with the exact (erf-based) GELU used by nn.GELU(); dropout(p=0) = identity.
    xr = x.reshape(-1, DIN).astype(jnp.bfloat16)
    h = jnp.dot(xr, fc1_w.T.astype(jnp.bfloat16),
                preferred_element_type=jnp.float32) + fc1_b
    h = jax.nn.gelu(h, approximate=False)
    ref = jnp.dot(h.astype(jnp.bfloat16), fc2_w.T.astype(jnp.bfloat16),
                  preferred_element_type=jnp.float32) + fc2_b
    ref = ref.reshape(B, S, DOUT).astype(x.dtype)

    assert jnp.allclose(out, ref, atol=2e-3, rtol=2e-2), (
        float(jnp.max(jnp.abs(out - ref))))

    print("KERNEL_OK")
</pallas_src>

<mosaic_0001>
module attributes {stable_mosaic.version = 11 : i64} {
  func.func @_mlp_kernel(%arg0: i32, %arg1: memref<16x128xf32, #tpu.memory_space<vmem>>, %arg2: memref<128x128xbf16, #tpu.memory_space<vmem>>, %arg3: memref<1x128xf32, #tpu.memory_space<vmem>>, %arg4: memref<128x128xbf16, #tpu.memory_space<vmem>>, %arg5: memref<1x128xf32, #tpu.memory_space<vmem>>, %arg6: memref<16x128xf32, #tpu.memory_space<vmem>>) attributes {dimension_semantics = [#tpu.dimension_semantics<parallel>], iteration_bounds = array<i64: 1>, scalar_prefetch = 0 : i64, scratch_operands = 0 : i64, tpu.core_type = #tpu.core_type<tc>, window_params = [{transform_indices = @transform_0, window_bounds = array<i64: 16, 128>}, {pipeline_mode = #tpu.pipeline_mode<synchronous>, transform_indices = @transform_1, window_bounds = array<i64: 128, 128>}, {pipeline_mode = #tpu.pipeline_mode<synchronous>, transform_indices = @transform_2, window_bounds = array<i64: 1, 128>}, {pipeline_mode = #tpu.pipeline_mode<synchronous>, transform_indices = @transform_3, window_bounds = array<i64: 128, 128>}, {pipeline_mode = #tpu.pipeline_mode<synchronous>, transform_indices = @transform_4, window_bounds = array<i64: 1, 128>}, {transform_indices = @transform_5, window_bounds = array<i64: 16, 128>}]} {
    %c0 = arith.constant 0 : index
    %c0_0 = arith.constant 0 : index
    %0 = vector.load %arg1[%c0, %c0_0] : memref<16x128xf32, #tpu.memory_space<vmem>>, vector<16x128xf32>
    %1 = arith.truncf %0 : vector<16x128xf32> to vector<16x128xbf16>
    %c0_1 = arith.constant 0 : index
    %c0_2 = arith.constant 0 : index
    %2 = vector.load %arg2[%c0_1, %c0_2] : memref<128x128xbf16, #tpu.memory_space<vmem>>, vector<128x128xbf16>
    %cst = arith.constant dense<0.000000e+00> : vector<16x128xf32>
    %3 = tpu.matmul %1, %2, %cst {dimension_numbers = #tpu.dot_dimension_numbers<[1], [0], [0], [1], [0, 0, 1, 1], [], []>} : vector<16x128xbf16>, vector<128x128xbf16>, vector<16x128xf32> -> vector<16x128xf32>
    %c0_3 = arith.constant 0 : index
    %c0_4 = arith.constant 0 : index
    %4 = vector.load %arg3[%c0_3, %c0_4] : memref<1x128xf32, #tpu.memory_space<vmem>>, vector<1x128xf32>
    %5 = vector.broadcast %4 : vector<1x128xf32> to vector<16x128xf32>
    %6 = arith.addf %3, %5 : vector<16x128xf32>
    %7 = math.absf %6 : vector<16x128xf32>
    %cst_5 = arith.constant 0.707106769 : f32
    %8 = vector.broadcast %cst_5 : f32 to vector<16x128xf32>
    %9 = arith.mulf %7, %8 : vector<16x128xf32>
    %cst_6 = arith.constant 0.327591091 : f32
    %10 = vector.broadcast %cst_6 : f32 to vector<16x128xf32>
    %11 = arith.mulf %10, %9 : vector<16x128xf32>
    %cst_7 = arith.constant 1.000000e+00 : f32
    %12 = vector.broadcast %cst_7 : f32 to vector<16x128xf32>
    %13 = arith.addf %12, %11 : vector<16x128xf32>
    %14 = tpu.reciprocal %13 {approx = true} : vector<16x128xf32> -> vector<16x128xf32>
    %cst_8 = arith.constant 1.06140542 : f32
    %15 = vector.broadcast %cst_8 : f32 to vector<16x128xf32>
    %16 = arith.mulf %15, %14 : vector<16x128xf32>
    %cst_9 = arith.constant -1.45315206 : f32
    %17 = vector.broadcast %cst_9 : f32 to vector<16x128xf32>
    %18 = arith.addf %16, %17 : vector<16x128xf32>
    %19 = arith.mulf %18, %14 : vector<16x128xf32>
    %cst_10 = arith.constant 1.42141378 : f32
    %20 = vector.broadcast %cst_10 : f32 to vector<16x128xf32>
    %21 = arith.addf %19, %20 : vector<16x128xf32>
    %22 = arith.mulf %21, %14 : vector<16x128xf32>
    %cst_11 = arith.constant -0.284496725 : f32
    %23 = vector.broadcast %cst_11 : f32 to vector<16x128xf32>
    %24 = arith.addf %22, %23 : vector<16x128xf32>
    %25 = arith.mulf %24, %14 : vector<16x128xf32>
    %cst_12 = arith.constant 0.254829586 : f32
    %26 = vector.broadcast %cst_12 : f32 to vector<16x128xf32>
    %27 = arith.addf %25, %26 : vector<16x128xf32>
    %28 = arith.mulf %27, %14 : vector<16x128xf32>
    %29 = arith.mulf %9, %9 : vector<16x128xf32>
    %cst_13 = arith.constant 0.000000e+00 : f32
    %30 = vector.broadcast %cst_13 : f32 to vector<16x128xf32>
    %31 = arith.subf %30, %29 : vector<16x128xf32>
    %32 = math.exp %31 : vector<16x128xf32>
    %33 = arith.mulf %28, %32 : vector<16x128xf32>
    %cst_14 = arith.constant 5.000000e-01 : f32
    %34 = vector.broadcast %cst_14 : f32 to vector<16x128xf32>
    %35 = arith.mulf %34, %6 : vector<16x128xf32>
    %cst_15 = arith.constant 0.000000e+00 : f32
    %36 = vector.broadcast %cst_15 : f32 to vector<16x128xf32>
    %37 = arith.cmpf oge, %6, %36 : vector<16x128xf32>
    %cst_16 = arith.constant 2.000000e+00 : f32
    %38 = vector.broadcast %cst_16 : f32 to vector<16x128xf32>
    %39 = arith.subf %38, %33 : vector<16x128xf32>
    %40 = arith.select %37, %39, %33 : vector<16x128xi1>, vector<16x128xf32>
    %41 = arith.mulf %35, %40 : vector<16x128xf32>
    %42 = arith.truncf %41 : vector<16x128xf32> to vector<16x128xbf16>
    %c0_17 = arith.constant 0 : index
    %c0_18 = arith.constant 0 : index
    %43 = vector.load %arg4[%c0_17, %c0_18] : memref<128x128xbf16, #tpu.memory_space<vmem>>, vector<128x128xbf16>
    %cst_19 = arith.constant dense<0.000000e+00> : vector<16x128xf32>
    %44 = tpu.matmul %42, %43, %cst_19 {dimension_numbers = #tpu.dot_dimension_numbers<[1], [0], [0], [1], [0, 0, 1, 1], [], []>} : vector<16x128xbf16>, vector<128x128xbf16>, vector<16x128xf32> -> vector<16x128xf32>
    %c0_20 = arith.constant 0 : index
    %c0_21 = arith.constant 0 : index
    %45 = vector.load %arg5[%c0_20, %c0_21] : memref<1x128xf32, #tpu.memory_space<vmem>>, vector<1x128xf32>
    %46 = vector.broadcast %45 : vector<1x128xf32> to vector<16x128xf32>
    %47 = arith.addf %44, %46 : vector<16x128xf32>
    %c0_22 = arith.constant 0 : index
    %c0_23 = arith.constant 0 : index
    %48 = vector.load %arg6[%c0_22, %c0_23] : memref<16x128xf32, #tpu.memory_space<vmem>>, vector<16x128xf32>
    tpu.vector_store %arg6[%c0_22, %c0_23], %47 {strides = array<i32>} : memref<16x128xf32, #tpu.memory_space<vmem>>, vector<16x128xf32>,
    return
  }
  func.func @transform_0(%arg0: i32) -> (i32, i32) {
    %c0_i32 = arith.constant 0 : i32
    %c0_i32_0 = arith.constant 0 : i32
    return %arg0, %c0_i32 : i32, i32
  }
  func.func @transform_1(%arg0: i32) -> (i32, i32) {
    %c0_i32 = arith.constant 0 : i32
    %c0_i32_0 = arith.constant 0 : i32
    %c0_i32_1 = arith.constant 0 : i32
    return %c0_i32, %c0_i32_0 : i32, i32
  }
  func.func @transform_2(%arg0: i32) -> (i32, i32) {
    %c0_i32 = arith.constant 0 : i32
    %c0_i32_0 = arith.constant 0 : i32
    %c0_i32_1 = arith.constant 0 : i32
    return %c0_i32, %c0_i32_0 : i32, i32
  }
  func.func @transform_3(%arg0: i32) -> (i32, i32) {
    %c0_i32 = arith.constant 0 : i32
    %c0_i32_0 = arith.constant 0 : i32
    %c0_i32_1 = arith.constant 0 : i32
    return %c0_i32, %c0_i32_0 : i32, i32
  }
  func.func @transform_4(%arg0: i32) -> (i32, i32) {
    %c0_i32 = arith.constant 0 : i32
    %c0_i32_0 = arith.constant 0 : i32
    %c0_i32_1 = arith.constant 0 : i32
    return %c0_i32, %c0_i32_0 : i32, i32
  }
  func.func @transform_5(%arg0: i32) -> (i32, i32) {
    %c0_i32 = arith.constant 0 : i32
    %c0_i32_0 = arith.constant 0 : i32
    return %arg0, %c0_i32 : i32, i32
  }
}

module attributes {stable_mosaic.version = 11 : i64} {
  func.func @_mlp_kernel(%arg0: i32, %arg1: memref<16x128xf32, #tpu.memory_space<vmem>>, %arg2: memref<128x128xbf16, #tpu.memory_space<vmem>>, %arg3: memref<1x128xf32, #tpu.memory_space<vmem>>, %arg4: memref<128x128xbf16, #tpu.memory_space<vmem>>, %arg5: memref<1x128xf32, #tpu.memory_space<vmem>>, %arg6: memref<16x128xf32, #tpu.memory_space<vmem>>) attributes {dimension_semantics = [#tpu.dimension_semantics<parallel>], iteration_bounds = array<i64: 1>, scalar_prefetch = 0 : i64, scratch_operands = 0 : i64, tpu.core_type = #tpu.core_type<tc>, window_params = [{transform_indices = @transform_0, window_bounds = array<i64: 16, 128>}, {pipeline_mode = #tpu.pipeline_mode<synchronous>, transform_indices = @transform_1, window_bounds = array<i64: 128, 128>}, {pipeline_mode = #tpu.pipeline_mode<synchronous>, transform_indices = @transform_2, window_bounds = array<i64: 1, 128>}, {pipeline_mode = #tpu.pipeline_mode<synchronous>, transform_indices = @transform_3, window_bounds = array<i64: 128, 128>}, {pipeline_mode = #tpu.pipeline_mode<synchronous>, transform_indices = @transform_4, window_bounds = array<i64: 1, 128>}, {transform_indices = @transform_5, window_bounds = array<i64: 16, 128>}]} {
    %c0 = arith.constant 0 : index
    %c0_0 = arith.constant 0 : index
    %0 = vector.load %arg1[%c0, %c0_0] : memref<16x128xf32, #tpu.memory_space<vmem>>, vector<16x128xf32>
    %1 = arith.truncf %0 : vector<16x128xf32> to vector<16x128xbf16>
    %c0_1 = arith.constant 0 : index
    %c0_2 = arith.constant 0 : index
    %2 = vector.load %arg2[%c0_1, %c0_2] : memref<128x128xbf16, #tpu.memory_space<vmem>>, vector<128x128xbf16>
    %cst = arith.constant dense<0.000000e+00> : vector<16x128xf32>
    %3 = tpu.matmul %1, %2, %cst {dimension_numbers = #tpu.dot_dimension_numbers<[1], [0], [0], [1], [0, 0, 1, 1], [], []>} : vector<16x128xbf16>, vector<128x128xbf16>, vector<16x128xf32> -> vector<16x128xf32>
    %c0_3 = arith.constant 0 : index
    %c0_4 = arith.constant 0 : index
    %4 = vector.load %arg3[%c0_3, %c0_4] : memref<1x128xf32, #tpu.memory_space<vmem>>, vector<1x128xf32>
    %5 = vector.broadcast %4 : vector<1x128xf32> to vector<16x128xf32>
    %6 = arith.addf %3, %5 : vector<16x128xf32>
    %7 = math.absf %6 : vector<16x128xf32>
    %cst_5 = arith.constant 0.707106769 : f32
    %8 = vector.broadcast %cst_5 : f32 to vector<16x128xf32>
    %9 = arith.mulf %7, %8 : vector<16x128xf32>
    %cst_6 = arith.constant 0.327591091 : f32
    %10 = vector.broadcast %cst_6 : f32 to vector<16x128xf32>
    %11 = arith.mulf %10, %9 : vector<16x128xf32>
    %cst_7 = arith.constant 1.000000e+00 : f32
    %12 = vector.broadcast %cst_7 : f32 to vector<16x128xf32>
    %13 = arith.addf %12, %11 : vector<16x128xf32>
    %14 = tpu.reciprocal %13 {approx = true} : vector<16x128xf32> -> vector<16x128xf32>
    %cst_8 = arith.constant 1.06140542 : f32
    %15 = vector.broadcast %cst_8 : f32 to vector<16x128xf32>
    %16 = arith.mulf %15, %14 : vector<16x128xf32>
    %cst_9 = arith.constant -1.45315206 : f32
    %17 = vector.broadcast %cst_9 : f32 to vector<16x128xf32>
    %18 = arith.addf %16, %17 : vector<16x128xf32>
    %19 = arith.mulf %18, %14 : vector<16x128xf32>
    %cst_10 = arith.constant 1.42141378 : f32
    %20 = vector.broadcast %cst_10 : f32 to vector<16x128xf32>
    %21 = arith.addf %19, %20 : vector<16x128xf32>
    %22 = arith.mulf %21, %14 : vector<16x128xf32>
    %cst_11 = arith.constant -0.284496725 : f32
    %23 = vector.broadcast %cst_11 : f32 to vector<16x128xf32>
    %24 = arith.addf %22, %23 : vector<16x128xf32>
    %25 = arith.mulf %24, %14 : vector<16x128xf32>
    %cst_12 = arith.constant 0.254829586 : f32
    %26 = vector.broadcast %cst_12 : f32 to vector<16x128xf32>
    %27 = arith.addf %25, %26 : vector<16x128xf32>
    %28 = arith.mulf %27, %14 : vector<16x128xf32>
    %29 = arith.mulf %9, %9 : vector<16x128xf32>
    %cst_13 = arith.constant 0.000000e+00 : f32
    %30 = vector.broadcast %cst_13 : f32 to vector<16x128xf32>
    %31 = arith.subf %30, %29 : vector<16x128xf32>
    %32 = math.exp %31 : vector<16x128xf32>
    %33 = arith.mulf %28, %32 : vector<16x128xf32>
    %cst_14 = arith.constant 5.000000e-01 : f32
    %34 = vector.broadcast %cst_14 : f32 to vector<16x128xf32>
    %35 = arith.mulf %34, %6 : vector<16x128xf32>
    %cst_15 = arith.constant 0.000000e+00 : f32
    %36 = vector.broadcast %cst_15 : f32 to vector<16x128xf32>
    %37 = arith.cmpf oge, %6, %36 : vector<16x128xf32>
    %cst_16 = arith.constant 2.000000e+00 : f32
    %38 = vector.broadcast %cst_16 : f32 to vector<16x128xf32>
    %39 = arith.subf %38, %33 : vector<16x128xf32>
    %40 = arith.select %37, %39, %33 : vector<16x128xi1>, vector<16x128xf32>
    %41 = arith.mulf %35, %40 : vector<16x128xf32>
    %42 = arith.truncf %41 : vector<16x128xf32> to vector<16x128xbf16>
    %c0_17 = arith.constant 0 : index
    %c0_18 = arith.constant 0 : index
    %43 = vector.load %arg4[%c0_17, %c0_18] : memref<128x128xbf16, #tpu.memory_space<vmem>>, vector<128x128xbf16>
    %cst_19 = arith.constant dense<0.000000e+00> : vector<16x128xf32>
    %44 = tpu.matmul %42, %43, %cst_19 {dimension_numbers = #tpu.dot_dimension_numbers<[1], [0], [0], [1], [0, 0, 1, 1], [], []>} : vector<16x128xbf16>, vector<128x128xbf16>, vector<16x128xf32> -> vector<16x128xf32>
    %c0_20 = arith.constant 0 : index
    %c0_21 = arith.constant 0 : index
    %45 = vector.load %arg5[%c0_20, %c0_21] : memref<1x128xf32, #tpu.memory_space<vmem>>, vector<1x128xf32>
    %46 = vector.broadcast %45 : vector<1x128xf32> to vector<16x128xf32>
    %47 = arith.addf %44, %46 : vector<16x128xf32>
    %c0_22 = arith.constant 0 : index
    %c0_23 = arith.constant 0 : index
    %48 = vector.load %arg6[%c0_22, %c0_23] : memref<16x128xf32, #tpu.memory_space<vmem>>, vector<16x128xf32>
    tpu.vector_store %arg6[%c0_22, %c0_23], %47 {strides = array<i32>} : memref<16x128xf32, #tpu.memory_space<vmem>>, vector<16x128xf32>,
    return
  }
  func.func @transform_0(%arg0: i32) -> (i32, i32) {
    %c0_i32 = arith.constant 0 : i32
    %c0_i32_0 = arith.constant 0 : i32
    return %arg0, %c0_i32 : i32, i32
  }
  func.func @transform_1(%arg0: i32) -> (i32, i32) {
    %c0_i32 = arith.constant 0 : i32
    %c0_i32_0 = arith.constant 0 : i32
    %c0_i32_1 = arith.constant 0 : i32
    return %c0_i32, %c0_i32_0 : i32, i32
  }
  func.func @transform_2(%arg0: i32) -> (i32, i32) {
    %c0_i32 = arith.constant 0 : i32
    %c0_i32_0 = arith.constant 0 : i32
    %c0_i32_1 = arith.constant 0 : i32
    return %c0_i32, %c0_i32_0 : i32, i32
  }
  func.func @transform_3(%arg0: i32) -> (i32, i32) {
    %c0_i32 = arith.constant 0 : i32
    %c0_i32_0 = arith.constant 0 : i32
    %c0_i32_1 = arith.constant 0 : i32
    return %c0_i32, %c0_i32_0 : i32, i32
  }
  func.func @transform_4(%arg0: i32) -> (i32, i32) {
    %c0_i32 = arith.constant 0 : i32
    %c0_i32_0 = arith.constant 0 : i32
    %c0_i32_1 = arith.constant 0 : i32
    return %c0_i32, %c0_i32_0 : i32, i32
  }
  func.func @transform_5(%arg0: i32) -> (i32, i32) {
    %c0_i32 = arith.constant 0 : i32
    %c0_i32_0 = arith.constant 0 : i32
    return %arg0, %c0_i32 : i32, i32
  }
}

</mosaic_0001>

<bundles_post_ra>
// kernel: tpu_custom_call.1
= control target key start
LH: loop header
LB: loop body
LE: loop exit
PB: predicated region body
PF: predicated region fallthrough
CT: control target
= control target key end

     0   :  { %10 = vsyncpa [#allocation3], 0  ;;  %s568_s0 = inlined_call_operand.hbm [shape: f32[16,128], index: 0, kind: input, shape index: {}]   ;;  %s569_s1 = inlined_call_operand.hbm [shape: bf16[128,128], index: 1, kind: input, shape index: {}]   ;;  %s570_s2 = inlined_call_operand.vmem [shape: f32[1,128], index: 2, kind: input, shape index: {}]   ;;  %s571_s3 = inlined_call_operand.hbm [shape: bf16[128,128], index: 3, kind: input, shape index: {}]   ;;  %s572_s4 = inlined_call_operand.vmem [shape: f32[1,128], index: 4, kind: input, shape index: {}]   ;;  %s573_s5 = inlined_call_operand.hbm [shape: f32[16,128], index: 5, kind: output, shape index: {}]  }
   0x1   :  { %11 = vsyncpa [#allocation6], 0  ;;  %s30_s20 = sshll.u32 %s569_s1, 4  ;;  %s31_s20 = int_to_ptr.hbm [resolvable:$true] %s30_s20 }
   0x2   :  { %12 = vsyncpa [#allocation4], 0  ;;  %s506_s21 = smov [#allocation5]   ;;  %s17_s25 = sshll.u32 %s568_s0, 4  ;;  %s18_s25 = int_to_ptr.hbm [resolvable:$true] %s17_s25 }
   0x3   :  { %s32_s22 = sshll.u32 %s506_s21, 4  ;;  %s507_s26 = smov 64   ;;  %s33_s22 = int_to_ptr.vmem [resolvable:$true] %s32_s22 }
   0x4   :  { %s508_s27 = smov 4   ;;  %s509_s28 = smov [#allocation2]  }
   0x5   :  { %38 = dma.hbm_to_vmem [thread:$0]  %s31_s20, 1024, %s33_s22, [#allocation6], %s507_s26, %s507_s26, %s508_s27  }
   0x6   :  { %s19_s29 = sshll.u32 %s509_s28, 4  ;;  %s510_s30 = smov 128   ;;  %s20_s29 = int_to_ptr.vmem [resolvable:$true] %s19_s29 }
   0x7   :  { %s511_s6 = smov 8   ;;  %s45_s8 = sshll.u32 %s571_s3, 4  ;;  %s46_s8 = int_to_ptr.hbm [resolvable:$true] %s45_s8 }
   0x8   :  { %25 = dma.hbm_to_vmem [thread:$0]  %s18_s25, 256, %s20_s29, [#allocation3], %s510_s30, %s510_s30, %s511_s6  }
   0x9   :  { %s512_s9 = smov [#allocation7]  }
   0xa   :  { %s47_s0 = sshll.u32 %s512_s9, 4  ;;  %s48_s0 = int_to_ptr.vmem [resolvable:$true] %s47_s0 }
   0xb   :  { %53 = dma.hbm_to_vmem [thread:$0]  %s46_s8, 1024, %s48_s0, [#allocation6], %s507_s26, %s507_s26, %s508_s27  }
   0xc   :  { %500 = dma.done.wait [#allocation3], 256  }
   0xd   :  { %501 = vsyncadd [#allocation3], 4294967040 }
   0xe   :  { %502 = dma.done.wait [#allocation6], 2048  }
   0xf   :  { %503 = vsyncadd [#allocation6], 4294965248  ;;  %v377_v0 = vld [vmem:[#allocation5 + $0x38] sm:$0xff]  ;;  %v376_v1 = vld [vmem:[#allocation5 + $0x30] sm:$0xff]  ;;  %s513_s12 = smov [#allocation8]   ;;  %s292_s16 = sshll.u32 %s573_s5, 4  ;;  %s293_s16 = int_to_ptr.hbm [resolvable:$true] %s292_s16 }
  0x10   :  { %139 = vmatpush.bf16.msra.mxu0 %v377_v0  ;;  %v375_v2 = vld [vmem:[#allocation5 + $0x28] sm:$0xff]  ;;  %v374_v3 = vld [vmem:[#allocation5 + $0x20] sm:$0xff]  ;;  %v373_v4 = vld [vmem:[#allocation5 + $0x18] sm:$0xff]  ;;  %s290_s13 = sshll.u32 %s513_s12, 4  ;;  %s291_s13 = int_to_ptr.vmem [resolvable:$true] %s290_s13 }
  0x11   :  { %v372_v5 = vld [vmem:[#allocation5 + $0x10] sm:$0xff]  ;;  %v371_v6 = vld [vmem:[#allocation5 + $0x8] sm:$0xff]  ;;  %v370_v7 = vld [vmem:[#allocation5] sm:$0xff] }
  0x12   :  { %v68_v8 = vld [vmem:[#allocation2] sm:$0xff]  ;;  %v69_v9 = vld [vmem:[#allocation2 + $0x8] sm:$0xff]  ;;  %v383_v13 = vld [vmem:[#allocation7 + $0x28] sm:$0xff] }
  0x13   :  { %v70_v10 = vpack.c.bf16 %v69_v9, %v68_v8  ;;  %v385_v11 = vld [vmem:[#allocation7 + $0x38] sm:$0xff]  ;;  %v384_v12 = vld [vmem:[#allocation7 + $0x30] sm:$0xff]  ;;  %v382_v15 = vld [vmem:[#allocation7 + $0x20] sm:$0xff] }
  0x14   :  { %140 = vmatpush.bf16.msra.mxu0 %v376_v1  ;;  %270 = vmatpush.bf16.msra.mxu1 %v385_v11  ;;  %v394_v14 = vld [vmem:[%s570_s2] ss:$0 sm:$0xff]  ;;  %v381_v19 = vld [vmem:[#allocation7 + $0x18] sm:$0xff]  ;;  %v379_v27 = vld [vmem:[#allocation7 + $0x8] sm:$0xff] }
  0x15   :  { %v380_v22 = vld [vmem:[#allocation7 + $0x10] sm:$0xff]  ;;  %v378_v30 = vld [vmem:[#allocation7] sm:$0xff] }
  0x18   :  { %141 = vmatpush.bf16.msra.mxu0 %v375_v2  ;;  %271 = vmatpush.bf16.msra.mxu1 %v384_v12 }
  0x1c   :  { %142 = vmatpush.bf16.msra.mxu0 %v374_v3  ;;  %272 = vmatpush.bf16.msra.mxu1 %v383_v13 }
  0x20   :  { %143 = vmatpush.bf16.msra.mxu0 %v373_v4  ;;  %273 = vmatpush.bf16.msra.mxu1 %v382_v15 }
  0x24   :  { %144 = vmatpush.bf16.msra.mxu0 %v372_v5  ;;  %274 = vmatpush.bf16.msra.mxu1 %v381_v19 }
  0x28   :  { %145 = vmatpush.bf16.msra.mxu0 %v371_v6  ;;  %275 = vmatpush.bf16.msra.mxu1 %v380_v22 }
  0x2c   :  { %146 = vmatpush.bf16.msra.mxu0 %v370_v7  ;;  %276 = vmatpush.bf16.msra.mxu1 %v379_v27  ;;  %v395_v7 = vld [vmem:[%s572_s4] ss:$0 sm:$0xff] }
  0x2f   :  { %147 = vmatmul.bf16.vlgmr.msra.gmra.mxu0 %v70_v10 }
  0x30   :  { %277 = vmatpush.bf16.msra.mxu1 %v378_v30 }
  0xac   :  { %v148_v16 = vpop.f32.mrf.mxu0 }
  0xad   :  { %v149_v17 = vadd.f32 %v394_v14, %v148_v16 }
  0xaf   :  { %v153_v18 = vand.u32 2147483647, %v149_v17  ;;  %vm193_vm0 = vcmp.ge.f32.partialorder %v149_v17, 0.0  ;;  %v191_v1 = vmul.f32 0.5, %v149_v17 }
  0xb1   :  { %v155_v20 = vmul.f32 0.70710677, %v153_v18 }
  0xb3   :  { %v157_v21 = vmul.f32 0.3275911, %v155_v20  ;;  %v181_v34 = vmul.f32 %v155_v20, %v155_v20 }
  0xb4   :  { %v150_v23 = vpop.f32.mrf.mxu0 }
  0xb5   :  { %v159_v24 = vadd.f32 1.0, %v157_v21  ;;  %v151_v25 = vadd.f32 %v394_v14, %v150_v23  ;;  %v183_v37 = vsub.f32 0.0, %v181_v34 }
  0xb7   :  { %396 = vrcp.f32 %v159_v24  ;;  %v154_v26 = vand.u32 2147483647, %v151_v25  ;;  %v185_v43 = vmul.f32 1.442695, %v183_v37  ;;  %v192_v2 = vmul.f32 0.5, %v151_v25 }
  0xb8   :  { %vm194_vm1 = vcmp.ge.f32.partialorder %v151_v25, 0.0 }
  0xb9   :  { %v156_v28 = vmul.f32 0.70710677, %v154_v26 }
  0xbb   :  { %v158_v29 = vmul.f32 0.3275911, %v156_v28  ;;  %v182_v40 = vmul.f32 %v156_v28, %v156_v28 }
  0xbd   :  { %v397_v31 = vpop.eup %396  ;;  %v160_v32 = vadd.f32 1.0, %v158_v29  ;;  %v184_v46 = vsub.f32 0.0, %v182_v40 }
  0xbe   :  { %v163_v33 = vmul.f32 1.0614054, %v397_v31 }
  0xbf   :  { %398 = vrcp.f32 %v160_v32  ;;  %v187_v51 = vmul.f32 1.442695, %v184_v46 }
  0xc0   :  { %v165_v35 = vadd.f32 -1.4531521, %v163_v33  ;;  %400 = vpow2.f32 %v185_v43 }
  0xc1   :  { %402 = vpow2.f32 %v187_v51 }
  0xc2   :  { %v167_v36 = vmul.f32 %v397_v31, %v165_v35 }
  0xc4   :  { %v169_v38 = vadd.f32 1.4214138, %v167_v36 }
  0xc5   :  { %v399_v39 = vpop.eup %398 }
  0xc6   :  { %v164_v41 = vmul.f32 1.0614054, %v399_v39  ;;  %v171_v42 = vmul.f32 %v397_v31, %v169_v38  ;;  %v401_v55 = vpop.eup %400 }
  0xc7   :  { %v403_v61 = vpop.eup %402 }
  0xc8   :  { %v166_v44 = vadd.f32 -1.4531521, %v164_v41  ;;  %v173_v45 = vadd.f32 -0.28449672, %v171_v42 }
  0xca   :  { %v168_v47 = vmul.f32 %v399_v39, %v166_v44  ;;  %v175_v48 = vmul.f32 %v397_v31, %v173_v45 }
  0xcc   :  { %v170_v49 = vadd.f32 1.4214138, %v168_v47  ;;  %v177_v50 = vadd.f32 0.2548296, %v175_v48 }
  0xce   :  { %v172_v52 = vmul.f32 %v399_v39, %v170_v49  ;;  %v179_v53 = vmul.f32 %v397_v31, %v177_v50 }
  0xd0   :  { %v174_v54 = vadd.f32 -0.28449672, %v172_v52  ;;  %v189_v57 = vmul.f32 %v401_v55, %v179_v53 }
  0xd2   :  { %v176_v56 = vmul.f32 %v399_v39, %v174_v54  ;;  %v195_v60 = vsub.f32 2.0, %v189_v57 }
  0xd4   :  { %v178_v58 = vadd.f32 0.2548296, %v176_v56  ;;  %v197_v0 = vsel %vm193_vm0, %v195_v60, %v189_v57 }
  0xd5   :  { %v199_v4 = vmul.f32 %v197_v0, %v191_v1 }
  0xd6   :  { %v180_v59 = vmul.f32 %v399_v39, %v178_v58 }
  0xd8   :  { %v190_v62 = vmul.f32 %v403_v61, %v180_v59 }
  0xda   :  { %v196_v63 = vsub.f32 2.0, %v190_v62 }
  0xdc   :  { %v198_v3 = vsel %vm194_vm1, %v196_v63, %v190_v62 }
  0xdd   :  { %v200_v5 = vmul.f32 %v198_v3, %v192_v2 }
  0xdf   :  { %v201_v6 = vpack.c.bf16 %v200_v5, %v199_v4 }
  0xe1   :  { %278 = vmatmul.bf16.vlgmr.msra.gmra.mxu1 %v201_v6 }
 0x15e   :  { %v279_v8 = vpop.f32.mrf.mxu1 }
 0x15f   :  { %v280_v9 = vadd.f32 %v395_v7, %v279_v8 }
 0x161   :  { %284 = vst [vmem:[#allocation8] sm:$0xff] %v280_v9 }
 0x166   :  { %v281_v10 = vpop.f32.mrf.mxu1 }
 0x167   :  { %v282_v11 = vadd.f32 %v395_v7, %v281_v10 }
 0x169   :  { %285 = vst [vmem:[#allocation8 + $0x8] sm:$0xff] %v282_v11 }
 0x16a   :  { %298 = dma.vmem_to_hbm [thread:$0]  %s291_s13, 256, %s293_s16, [#allocation4], %s510_s30, %s510_s30, %s511_s6  }
 0x16b   :  { %504 = dma.done.wait [#allocation4], 256  }
 0x16c   :  { %505 = vsyncadd [#allocation4], 4294967040 }
 0x16d   :  { %303 = vsyncpa [#allocation3], 1 }
 0x16e   :  { %304 = vsyncpa [#allocation6], 1 }
 0x16f   :  { %305 = vsyncpa [#allocation4], 1 }

// kernel: tpu_custom_call.1
= control target key start
LH: loop header
LB: loop body
LE: loop exit
PB: predicated region body
PF: predicated region fallthrough
CT: control target
= control target key end

     0   :  { %10 = vsyncpa [#allocation3], 0  ;;  %s568_s0 = inlined_call_operand.hbm [shape: f32[16,128], index: 0, kind: input, shape index: {}]   ;;  %s569_s1 = inlined_call_operand.hbm [shape: bf16[128,128], index: 1, kind: input, shape index: {}]   ;;  %s570_s2 = inlined_call_operand.vmem [shape: f32[1,128], index: 2, kind: input, shape index: {}]   ;;  %s571_s3 = inlined_call_operand.hbm [shape: bf16[128,128], index: 3, kind: input, shape index: {}]   ;;  %s572_s4 = inlined_call_operand.vmem [shape: f32[1,128], index: 4, kind: input, shape index: {}]   ;;  %s573_s5 = inlined_call_operand.hbm [shape: f32[16,128], index: 5, kind: output, shape index: {}]  }
   0x1   :  { %11 = vsyncpa [#allocation6], 0  ;;  %s30_s20 = sshll.u32 %s569_s1, 4  ;;  %s31_s20 = int_to_ptr.hbm [resolvable:$true] %s30_s20 }
   0x2   :  { %12 = vsyncpa [#allocation4], 0  ;;  %s506_s21 = smov [#allocation5]   ;;  %s17_s25 = sshll.u32 %s568_s0, 4  ;;  %s18_s25 = int_to_ptr.hbm [resolvable:$true] %s17_s25 }
   0x3   :  { %s32_s22 = sshll.u32 %s506_s21, 4  ;;  %s507_s26 = smov 64   ;;  %s33_s22 = int_to_ptr.vmem [resolvable:$true] %s32_s22 }
   0x4   :  { %s508_s27 = smov 4   ;;  %s509_s28 = smov [#allocation2]  }
   0x5   :  { %38 = dma.hbm_to_vmem [thread:$0]  %s31_s20, 1024, %s33_s22, [#allocation6], %s507_s26, %s507_s26, %s508_s27  }
   0x6   :  { %s19_s29 = sshll.u32 %s509_s28, 4  ;;  %s510_s30 = smov 128   ;;  %s20_s29 = int_to_ptr.vmem [resolvable:$true] %s19_s29 }
   0x7   :  { %s511_s6 = smov 8   ;;  %s45_s8 = sshll.u32 %s571_s3, 4  ;;  %s46_s8 = int_to_ptr.hbm [resolvable:$true] %s45_s8 }
   0x8   :  { %25 = dma.hbm_to_vmem [thread:$0]  %s18_s25, 256, %s20_s29, [#allocation3], %s510_s30, %s510_s30, %s511_s6  }
   0x9   :  { %s512_s9 = smov [#allocation7]  }
   0xa   :  { %s47_s0 = sshll.u32 %s512_s9, 4  ;;  %s48_s0 = int_to_ptr.vmem [resolvable:$true] %s47_s0 }
   0xb   :  { %53 = dma.hbm_to_vmem [thread:$0]  %s46_s8, 1024, %s48_s0, [#allocation6], %s507_s26, %s507_s26, %s508_s27  }
   0xc   :  { %500 = dma.done.wait [#allocation3], 256  }
   0xd   :  { %501 = vsyncadd [#allocation3], 4294967040 }
   0xe   :  { %502 = dma.done.wait [#allocation6], 2048  }
   0xf   :  { %503 = vsyncadd [#allocation6], 4294965248  ;;  %v377_v0 = vld [vmem:[#allocation5 + $0x38] sm:$0xff]  ;;  %v376_v1 = vld [vmem:[#allocation5 + $0x30] sm:$0xff]  ;;  %s513_s12 = smov [#allocation8]   ;;  %s292_s16 = sshll.u32 %s573_s5, 4  ;;  %s293_s16 = int_to_ptr.hbm [resolvable:$true] %s292_s16 }
  0x10   :  { %139 = vmatpush.bf16.msra.mxu0 %v377_v0  ;;  %v375_v2 = vld [vmem:[#allocation5 + $0x28] sm:$0xff]  ;;  %v374_v3 = vld [vmem:[#allocation5 + $0x20] sm:$0xff]  ;;  %v373_v4 = vld [vmem:[#allocation5 + $0x18] sm:$0xff]  ;;  %s290_s13 = sshll.u32 %s513_s12, 4  ;;  %s291_s13 = int_to_ptr.vmem [resolvable:$true] %s290_s13 }
  0x11   :  { %v372_v5 = vld [vmem:[#allocation5 + $0x10] sm:$0xff]  ;;  %v371_v6 = vld [vmem:[#allocation5 + $0x8] sm:$0xff]  ;;  %v370_v7 = vld [vmem:[#allocation5] sm:$0xff] }
  0x12   :  { %v68_v8 = vld [vmem:[#allocation2] sm:$0xff]  ;;  %v69_v9 = vld [vmem:[#allocation2 + $0x8] sm:$0xff]  ;;  %v383_v13 = vld [vmem:[#allocation7 + $0x28] sm:$0xff] }
  0x13   :  { %v70_v10 = vpack.c.bf16 %v69_v9, %v68_v8  ;;  %v385_v11 = vld [vmem:[#allocation7 + $0x38] sm:$0xff]  ;;  %v384_v12 = vld [vmem:[#allocation7 + $0x30] sm:$0xff]  ;;  %v382_v15 = vld [vmem:[#allocation7 + $0x20] sm:$0xff] }
  0x14   :  { %140 = vmatpush.bf16.msra.mxu0 %v376_v1  ;;  %270 = vmatpush.bf16.msra.mxu1 %v385_v11  ;;  %v394_v14 = vld [vmem:[%s570_s2] ss:$0 sm:$0xff]  ;;  %v381_v19 = vld [vmem:[#allocation7 + $0x18] sm:$0xff]  ;;  %v379_v27 = vld [vmem:[#allocation7 + $0x8] sm:$0xff] }
  0x15   :  { %v380_v22 = vld [vmem:[#allocation7 + $0x10] sm:$0xff]  ;;  %v378_v30 = vld [vmem:[#allocation7] sm:$0xff] }
  0x18   :  { %141 = vmatpush.bf16.msra.mxu0 %v375_v2  ;;  %271 = vmatpush.bf16.msra.mxu1 %v384_v12 }
  0x1c   :  { %142 = vmatpush.bf16.msra.mxu0 %v374_v3  ;;  %272 = vmatpush.bf16.msra.mxu1 %v383_v13 }
  0x20   :  { %143 = vmatpush.bf16.msra.mxu0 %v373_v4  ;;  %273 = vmatpush.bf16.msra.mxu1 %v382_v15 }
  0x24   :  { %144 = vmatpush.bf16.msra.mxu0 %v372_v5  ;;  %274 = vmatpush.bf16.msra.mxu1 %v381_v19 }
  0x28   :  { %145 = vmatpush.bf16.msra.mxu0 %v371_v6  ;;  %275 = vmatpush.bf16.msra.mxu1 %v380_v22 }
  0x2c   :  { %146 = vmatpush.bf16.msra.mxu0 %v370_v7  ;;  %276 = vmatpush.bf16.msra.mxu1 %v379_v27  ;;  %v395_v7 = vld [vmem:[%s572_s4] ss:$0 sm:$0xff] }
  0x2f   :  { %147 = vmatmul.bf16.vlgmr.msra.gmra.mxu0 %v70_v10 }
  0x30   :  { %277 = vmatpush.bf16.msra.mxu1 %v378_v30 }
  0xac   :  { %v148_v16 = vpop.f32.mrf.mxu0 }
  0xad   :  { %v149_v17 = vadd.f32 %v394_v14, %v148_v16 }
  0xaf   :  { %v153_v18 = vand.u32 2147483647, %v149_v17  ;;  %vm193_vm0 = vcmp.ge.f32.partialorder %v149_v17, 0.0  ;;  %v191_v1 = vmul.f32 0.5, %v149_v17 }
  0xb1   :  { %v155_v20 = vmul.f32 0.70710677, %v153_v18 }
  0xb3   :  { %v157_v21 = vmul.f32 0.3275911, %v155_v20  ;;  %v181_v34 = vmul.f32 %v155_v20, %v155_v20 }
  0xb4   :  { %v150_v23 = vpop.f32.mrf.mxu0 }
  0xb5   :  { %v159_v24 = vadd.f32 1.0, %v157_v21  ;;  %v151_v25 = vadd.f32 %v394_v14, %v150_v23  ;;  %v183_v37 = vsub.f32 0.0, %v181_v34 }
  0xb7   :  { %396 = vrcp.f32 %v159_v24  ;;  %v154_v26 = vand.u32 2147483647, %v151_v25  ;;  %v185_v43 = vmul.f32 1.442695, %v183_v37  ;;  %v192_v2 = vmul.f32 0.5, %v151_v25 }
  0xb8   :  { %vm194_vm1 = vcmp.ge.f32.partialorder %v151_v25, 0.0 }
  0xb9   :  { %v156_v28 = vmul.f32 0.70710677, %v154_v26 }
  0xbb   :  { %v158_v29 = vmul.f32 0.3275911, %v156_v28  ;;  %v182_v40 = vmul.f32 %v156_v28, %v156_v28 }
  0xbd   :  { %v397_v31 = vpop.eup %396  ;;  %v160_v32 = vadd.f32 1.0, %v158_v29  ;;  %v184_v46 = vsub.f32 0.0, %v182_v40 }
  0xbe   :  { %v163_v33 = vmul.f32 1.0614054, %v397_v31 }
  0xbf   :  { %398 = vrcp.f32 %v160_v32  ;;  %v187_v51 = vmul.f32 1.442695, %v184_v46 }
  0xc0   :  { %v165_v35 = vadd.f32 -1.4531521, %v163_v33  ;;  %400 = vpow2.f32 %v185_v43 }
  0xc1   :  { %402 = vpow2.f32 %v187_v51 }
  0xc2   :  { %v167_v36 = vmul.f32 %v397_v31, %v165_v35 }
  0xc4   :  { %v169_v38 = vadd.f32 1.4214138, %v167_v36 }
  0xc5   :  { %v399_v39 = vpop.eup %398 }
  0xc6   :  { %v164_v41 = vmul.f32 1.0614054, %v399_v39  ;;  %v171_v42 = vmul.f32 %v397_v31, %v169_v38  ;;  %v401_v55 = vpop.eup %400 }
  0xc7   :  { %v403_v61 = vpop.eup %402 }
  0xc8   :  { %v166_v44 = vadd.f32 -1.4531521, %v164_v41  ;;  %v173_v45 = vadd.f32 -0.28449672, %v171_v42 }
  0xca   :  { %v168_v47 = vmul.f32 %v399_v39, %v166_v44  ;;  %v175_v48 = vmul.f32 %v397_v31, %v173_v45 }
  0xcc   :  { %v170_v49 = vadd.f32 1.4214138, %v168_v47  ;;  %v177_v50 = vadd.f32 0.2548296, %v175_v48 }
  0xce   :  { %v172_v52 = vmul.f32 %v399_v39, %v170_v49  ;;  %v179_v53 = vmul.f32 %v397_v31, %v177_v50 }
  0xd0   :  { %v174_v54 = vadd.f32 -0.28449672, %v172_v52  ;;  %v189_v57 = vmul.f32 %v401_v55, %v179_v53 }
  0xd2   :  { %v176_v56 = vmul.f32 %v399_v39, %v174_v54  ;;  %v195_v60 = vsub.f32 2.0, %v189_v57 }
  0xd4   :  { %v178_v58 = vadd.f32 0.2548296, %v176_v56  ;;  %v197_v0 = vsel %vm193_vm0, %v195_v60, %v189_v57 }
  0xd5   :  { %v199_v4 = vmul.f32 %v197_v0, %v191_v1 }
  0xd6   :  { %v180_v59 = vmul.f32 %v399_v39, %v178_v58 }
  0xd8   :  { %v190_v62 = vmul.f32 %v403_v61, %v180_v59 }
  0xda   :  { %v196_v63 = vsub.f32 2.0, %v190_v62 }
  0xdc   :  { %v198_v3 = vsel %vm194_vm1, %v196_v63, %v190_v62 }
  0xdd   :  { %v200_v5 = vmul.f32 %v198_v3, %v192_v2 }
  0xdf   :  { %v201_v6 = vpack.c.bf16 %v200_v5, %v199_v4 }
  0xe1   :  { %278 = vmatmul.bf16.vlgmr.msra.gmra.mxu1 %v201_v6 }
 0x15e   :  { %v279_v8 = vpop.f32.mrf.mxu1 }
 0x15f   :  { %v280_v9 = vadd.f32 %v395_v7, %v279_v8 }
 0x161   :  { %284 = vst [vmem:[#allocation8] sm:$0xff] %v280_v9 }
 0x166   :  { %v281_v10 = vpop.f32.mrf.mxu1 }
 0x167   :  { %v282_v11 = vadd.f32 %v395_v7, %v281_v10 }
 0x169   :  { %285 = vst [vmem:[#allocation8 + $0x8] sm:$0xff] %v282_v11 }
 0x16a   :  { %298 = dma.vmem_to_hbm [thread:$0]  %s291_s13, 256, %s293_s16, [#allocation4], %s510_s30, %s510_s30, %s511_s6  }
 0x16b   :  { %504 = dma.done.wait [#allocation4], 256  }
 0x16c   :  { %505 = vsyncadd [#allocation4], 4294967040 }
 0x16d   :  { %303 = vsyncpa [#allocation3], 1 }
 0x16e   :  { %304 = vsyncpa [#allocation6], 1 }
 0x16f   :  { %305 = vsyncpa [#allocation4], 1 }

</bundles_post_ra>
